<compile_context>
chip_gen: v7x
topology: tpu7x:2x2x1
jax: 0.10.0
libtpu: 0.0.40
codegen_flags: <defaults>
</compile_context>

<pallas_src>
import functools
import math
import numpy as np
import jax
import jax.numpy as jnp
from jax.experimental import pallas as pl
from jax.experimental.pallas import tpu as pltpu


# ----------------------------- config helpers (port of the PyTorch spec) -----------------------------
def find_closest_divisor(total_value: int, target_divisor: int, max_delta: int = 100) -> int:
    if total_value % target_divisor == 0:
        return target_divisor
    for delta in range(1, max_delta + 1):
        cand = target_divisor - delta
        if cand > 0 and total_value % cand == 0:
            return cand
        cand = target_divisor + delta
        if total_value % cand == 0:
            return cand
    best, best_diff = 1, abs(target_divisor - 1)
    for i in range(2, int(math.isqrt(total_value)) + 1):
        if total_value % i == 0:
            for d in (i, total_value // i):
                if abs(target_divisor - d) < best_diff:
                    best, best_diff = d, abs(target_divisor - d)
    if abs(target_divisor - total_value) < best_diff:
        best = total_value
    return best


def sinusoidal_pe(seq_len: int, embed_dim: int) -> jnp.ndarray:
    """Matches LMA_InitialTransform_RL._positional_encoding."""
    position = np.arange(seq_len, dtype=np.float32)[:, None]
    div_term = np.exp(np.arange(0, embed_dim, 2, dtype=np.float32) * (-math.log(10000.0) / embed_dim))
    pe = np.zeros((seq_len, embed_dim), dtype=np.float32)
    pe[:, 0::2] = np.sin(position * div_term)
    pe[:, 1::2] = np.cos(position * div_term)
    return jnp.asarray(pe)


def _pick_batch_tile(B: int, L: int) -> int:
    """Batch elements per grid step: keep >=2 'parallel' steps (v7x has 2 TCs) and, when B is
    large, enough rows per matmul to feed the MXU. Must divide B (no ragged batch tiles)."""
    if B <= 2:
        return 1
    target = max(1, min(B // 2, (128 + L - 1) // L))
    for tb in range(target, 0, -1):
        if B % tb == 0:
            return tb
    return 1


# ----------------------------- fused kernel + wrapper -----------------------------
def lma_initial_transform_rl(x, we, be, w2, b2, pe, *, num_heads_stacking, L_new, C_new):
    """x: (B, L, F). Returns (B, L_new, d_new). Single fused pallas_call over batch tiles."""
    B, L, F = x.shape
    d0 = we.shape[1]
    d_new = w2.shape[1]
    nh = num_heads_stacking
    if d0 % nh != 0:
        raise ValueError("embed_dim must be divisible by num_heads_stacking")
    dk = d0 // nh
    if C_new % dk != 0:
        # TODO(synk): general rechunk (C_new not a multiple of dk) needs an in-kernel minor-dim
        # reshape; only the (common) divisible case is implemented here.
        raise NotImplementedError("C_new must be a multiple of embed_dim // num_heads_stacking")
    r = C_new // dk

    TB = _pick_batch_tile(B, L)
    M = TB * L_new           # output rows per grid step
    S = TB * nh * L          # stacked rows per grid step (== M * r)

    prec = jax.lax.Precision.HIGHEST   # f32 parity with the PyTorch module

    # ---- one-time parameter/layout prep (pure weight plumbing; fold at init time in a real model) ----
    we_h = jnp.stack([we[:, h * dk:(h + 1) * dk] for h in range(nh)])       # (nh, F, dk)
    be_h = jnp.stack([be[:, h * dk:(h + 1) * dk] for h in range(nh)])       # (nh, 1, dk)
    pe_t = jnp.tile(pe, (TB, 1)) if TB > 1 else pe                          # (TB*L, d0)
    pe_h = jnp.stack([pe_t[:, h * dk:(h + 1) * dk] for h in range(nh)])     # (nh, TB*L, dk)
    w2_c = jnp.stack([w2[j * dk:(j + 1) * dk, :] for j in range(r)])        # (r, dk, d_new)
    # Row-interleave selection matrices: (sel[j] @ stacked)[m] == stacked[m*r + j].
    sel_np = np.zeros((r, M, S), dtype=np.float32)
    m_idx = np.arange(M)
    for j in range(r):
        sel_np[j, m_idx, m_idx * r + j] = 1.0
    sel = jnp.asarray(sel_np)

    def kernel(x_ref, we_ref, be_ref, pe_ref, sel_ref, w2_ref, b2_ref, o_ref):
        # ---- stage 1: input_embedding + ReLU + positional encoding, per head ----
        x2d = x_ref[0] if TB == 1 else x_ref[...].reshape(TB * L, F)        # (TB*L, F)
        heads = []
        for h in range(nh):
            yh = jnp.dot(x2d, we_ref[h], preferred_element_type=jnp.float32, precision=prec)
            yh = jnp.maximum(yh + be_ref[h], 0.0)          # ReLU(input_embedding)
            yh = yh + pe_ref[h]                            # sinusoidal positional encoding
            heads.append(yh)                               # (TB*L, dk)
        # TODO(synk): embedding_dropout is identity in eval mode; training dropout (pltpu.prng_*) not implemented.

        # ---- multi-head stacking: rows ordered (tb, h, l) == torch.cat(torch.split(y, dk, 2), 1) ----
        if TB == 1:
            parts = heads
        else:
            parts = [heads[h][tb * L:(tb + 1) * L, :] for tb in range(TB) for h in range(nh)]
        stacked = jnp.concatenate(parts, axis=0)           # (S, dk)

        # ---- rechunk + embed_layer_2 + ReLU, with no in-kernel reshape ----
        #   xr[m, j*dk:(j+1)*dk] = stacked[m*r + j]  ->  z = sum_j (sel[j] @ stacked) @ W2_j
        acc = None
        for j in range(r):
            rows_j = jnp.dot(sel_ref[j], stacked, preferred_element_type=jnp.float32, precision=prec)
            term = jnp.dot(rows_j, w2_ref[j], preferred_element_type=jnp.float32, precision=prec)
            acc = term if acc is None else acc + term
        z = jnp.maximum(acc + b2_ref[...], 0.0)            # (M, d_new)

        if TB == 1:
            o_ref[0] = z.astype(o_ref.dtype)
        else:
            o_ref[...] = z.reshape(TB, L_new, d_new).astype(o_ref.dtype)

    out = pl.pallas_call(
        kernel,
        out_shape=jax.ShapeDtypeStruct((B, L_new, d_new), x.dtype),
        grid=(B // TB,),
        in_specs=[
            pl.BlockSpec((TB, L, F), lambda i: (i, 0, 0)),          # x: one batch tile per step
            pl.BlockSpec((nh, F, dk), lambda i: (0, 0, 0)),         # per-head We (VMEM-resident)
            pl.BlockSpec((nh, 1, dk), lambda i: (0, 0, 0)),         # per-head be
            pl.BlockSpec((nh, TB * L, dk), lambda i: (0, 0, 0)),    # per-head PE
            pl.BlockSpec((r, M, S), lambda i: (0, 0, 0)),           # rechunk selection matrices
            pl.BlockSpec((r, dk, d_new), lambda i: (0, 0, 0)),      # W2 row-chunks
            pl.BlockSpec((1, d_new), lambda i: (0, 0)),             # b2
        ],
        out_specs=pl.BlockSpec((TB, L_new, d_new), lambda i: (i, 0, 0)),
        compiler_params=pltpu.CompilerParams(dimension_semantics=("parallel",)),
    )(x, we_h, be_h, pe_h, sel, w2_c, b2)
    return out


# ----------------------------- pure-JAX reference (mirrors the PyTorch forward) -----------------------------
def _reference(x, we, be, w2, b2, pe, nh, L_new, C_new):
    prec = jax.lax.Precision.HIGHEST
    y = jnp.maximum(jnp.einsum("blf,fd->bld", x, we, precision=prec) + be[0], 0.0)
    y = y + pe
    stacked = jnp.concatenate(jnp.split(y, nh, axis=2), axis=1)          # (B, L*nh, dk)
    B = x.shape[0]
    x_rechunked = stacked.reshape(B, L_new, C_new)
    z = jnp.maximum(jnp.einsum("blc,cd->bld", x_rechunked, w2, precision=prec) + b2[0], 0.0)
    return z


if __name__ == "__main__":
    # Small config consistent with LMAConfigRL:
    #   features_per_step=16, seq_len=8, embed_dim=32, num_heads_stacking=4,
    #   target_l_new=16 -> L_new=16, C_new=16, d_new=32, dropout inactive at eval, bias=True.
    B, L, F = 2, 8, 16
    d0, nh = 32, 4
    target_l_new, d_new = 16, 32

    total_features = L * d0
    L_new = find_closest_divisor(total_features, target_l_new)
    C_new = total_features // L_new

    key = jax.random.PRNGKey(0)
    kx, kwe, kbe, kw2, kb2 = jax.random.split(key, 5)

    x = jax.random.normal(kx, (B, L, F), dtype=jnp.float32)

    # Deterministic nn.Linear-style init; weights stored (in, out) so the kernel computes x @ W.
    bnd1 = 1.0 / math.sqrt(F)
    bnd2 = 1.0 / math.sqrt(C_new)
    we = jax.random.uniform(kwe, (F, d0), jnp.float32, -bnd1, bnd1)
    be = jax.random.uniform(kbe, (1, d0), jnp.float32, -bnd1, bnd1)
    w2 = jax.random.uniform(kw2, (C_new, d_new), jnp.float32, -bnd2, bnd2)
    b2 = jax.random.uniform(kb2, (1, d_new), jnp.float32, -bnd2, bnd2)

    pe = sinusoidal_pe(L, d0)

    fwd = jax.jit(functools.partial(lma_initial_transform_rl,
                                    num_heads_stacking=nh, L_new=L_new, C_new=C_new))
    z = fwd(x, we, be, w2, b2, pe)
    jax.block_until_ready(z)

    z_ref = _reference(x, we, be, w2, b2, pe, nh, L_new, C_new)
    assert z.shape == (B, L_new, d_new)
    assert jnp.allclose(z, z_ref, atol=1e-5, rtol=1e-5), "mismatch vs. reference"

    print("KERNEL_OK")
</pallas_src>

<mosaic_0001>
module attributes {stable_mosaic.version = 11 : i64} {
  func.func @kernel(%arg0: i32, %arg1: memref<1x8x16xf32, #tpu.memory_space<vmem>>, %arg2: memref<4x16x8xf32, #tpu.memory_space<vmem>>, %arg3: memref<4x1x8xf32, #tpu.memory_space<vmem>>, %arg4: memref<4x8x8xf32, #tpu.memory_space<vmem>>, %arg5: memref<2x16x32xf32, #tpu.memory_space<vmem>>, %arg6: memref<2x8x32xf32, #tpu.memory_space<vmem>>, %arg7: memref<1x32xf32, #tpu.memory_space<vmem>>, %arg8: memref<1x16x32xf32, #tpu.memory_space<vmem>>) attributes {dimension_semantics = [#tpu.dimension_semantics<parallel>], iteration_bounds = array<i64: 2>, scalar_prefetch = 0 : i64, scratch_operands = 0 : i64, tpu.core_type = #tpu.core_type<tc>, window_params = [{transform_indices = @transform_0, window_bounds = array<i64: 1, 8, 16>}, {pipeline_mode = #tpu.pipeline_mode<synchronous>, transform_indices = @transform_1, window_bounds = array<i64: 4, 16, 8>}, {pipeline_mode = #tpu.pipeline_mode<synchronous>, transform_indices = @transform_2, window_bounds = array<i64: 4, 1, 8>}, {pipeline_mode = #tpu.pipeline_mode<synchronous>, transform_indices = @transform_3, window_bounds = array<i64: 4, 8, 8>}, {pipeline_mode = #tpu.pipeline_mode<synchronous>, transform_indices = @transform_4, window_bounds = array<i64: 2, 16, 32>}, {pipeline_mode = #tpu.pipeline_mode<synchronous>, transform_indices = @transform_5, window_bounds = array<i64: 2, 8, 32>}, {pipeline_mode = #tpu.pipeline_mode<synchronous>, transform_indices = @transform_6, window_bounds = array<i64: 1, 32>}, {transform_indices = @transform_7, window_bounds = array<i64: 1, 16, 32>}]} {
    %c0 = arith.constant 0 : index
    %c0_0 = arith.constant 0 : index
    %c0_1 = arith.constant 0 : index
    %0 = vector.load %arg1[%c0, %c0_0, %c0_1] : memref<1x8x16xf32, #tpu.memory_space<vmem>>, vector<1x8x16xf32>
    %1 = vector.shape_cast %0 : vector<1x8x16xf32> to vector<8x16xf32>
    %c0_2 = arith.constant 0 : index
    %c0_3 = arith.constant 0 : index
    %c0_4 = arith.constant 0 : index
    %2 = vector.load %arg2[%c0_2, %c0_3, %c0_4] : memref<4x16x8xf32, #tpu.memory_space<vmem>>, vector<1x16x8xf32>
    %3 = vector.shape_cast %2 : vector<1x16x8xf32> to vector<16x8xf32>
    %cst = arith.constant dense<0.000000e+00> : vector<8x8xf32>
    %4 = tpu.matmul %1, %3, %cst {dimension_numbers = #tpu.dot_dimension_numbers<[1], [0], [0], [1], [0, 0, 1, 1], [], []>, precision = #tpu.contract_precision<fp32>} : vector<8x16xf32>, vector<16x8xf32>, vector<8x8xf32> -> vector<8x8xf32>
    %c0_5 = arith.constant 0 : index
    %c0_6 = arith.constant 0 : index
    %c0_7 = arith.constant 0 : index
    %5 = vector.load %arg3[%c0_5, %c0_6, %c0_7] : memref<4x1x8xf32, #tpu.memory_space<vmem>>, vector<1x1x8xf32>
    %6 = vector.shape_cast %5 : vector<1x1x8xf32> to vector<1x8xf32>
    %7 = vector.broadcast %6 : vector<1x8xf32> to vector<8x8xf32>
    %8 = arith.addf %4, %7 : vector<8x8xf32>
    %cst_8 = arith.constant 0.000000e+00 : f32
    %9 = vector.broadcast %cst_8 : f32 to vector<8x8xf32>
    %10 = arith.maximumf %8, %9 : vector<8x8xf32>
    %c0_9 = arith.constant 0 : index
    %c0_10 = arith.constant 0 : index
    %c0_11 = arith.constant 0 : index
    %11 = vector.load %arg4[%c0_9, %c0_10, %c0_11] : memref<4x8x8xf32, #tpu.memory_space<vmem>>, vector<1x8x8xf32>
    %12 = vector.shape_cast %11 : vector<1x8x8xf32> to vector<8x8xf32>
    %13 = arith.addf %10, %12 : vector<8x8xf32>
    %c1 = arith.constant 1 : index
    %c0_12 = arith.constant 0 : index
    %c0_13 = arith.constant 0 : index
    %14 = vector.load %arg2[%c1, %c0_12, %c0_13] : memref<4x16x8xf32, #tpu.memory_space<vmem>>, vector<1x16x8xf32>
    %15 = vector.shape_cast %14 : vector<1x16x8xf32> to vector<16x8xf32>
    %cst_14 = arith.constant dense<0.000000e+00> : vector<8x8xf32>
    %16 = tpu.matmul %1, %15, %cst_14 {dimension_numbers = #tpu.dot_dimension_numbers<[1], [0], [0], [1], [0, 0, 1, 1], [], []>, precision = #tpu.contract_precision<fp32>} : vector<8x16xf32>, vector<16x8xf32>, vector<8x8xf32> -> vector<8x8xf32>
    %c1_15 = arith.constant 1 : index
    %c0_16 = arith.constant 0 : index
    %c0_17 = arith.constant 0 : index
    %17 = vector.load %arg3[%c1_15, %c0_16, %c0_17] : memref<4x1x8xf32, #tpu.memory_space<vmem>>, vector<1x1x8xf32>
    %18 = vector.shape_cast %17 : vector<1x1x8xf32> to vector<1x8xf32>
    %19 = vector.broadcast %18 : vector<1x8xf32> to vector<8x8xf32>
    %20 = arith.addf %16, %19 : vector<8x8xf32>
    %cst_18 = arith.constant 0.000000e+00 : f32
    %21 = vector.broadcast %cst_18 : f32 to vector<8x8xf32>
    %22 = arith.maximumf %20, %21 : vector<8x8xf32>
    %c1_19 = arith.constant 1 : index
    %c0_20 = arith.constant 0 : index
    %c0_21 = arith.constant 0 : index
    %23 = vector.load %arg4[%c1_19, %c0_20, %c0_21] : memref<4x8x8xf32, #tpu.memory_space<vmem>>, vector<1x8x8xf32>
    %24 = vector.shape_cast %23 : vector<1x8x8xf32> to vector<8x8xf32>
    %25 = arith.addf %22, %24 : vector<8x8xf32>
    %c2 = arith.constant 2 : index
    %c0_22 = arith.constant 0 : index
    %c0_23 = arith.constant 0 : index
    %26 = vector.load %arg2[%c2, %c0_22, %c0_23] : memref<4x16x8xf32, #tpu.memory_space<vmem>>, vector<1x16x8xf32>
    %27 = vector.shape_cast %26 : vector<1x16x8xf32> to vector<16x8xf32>
    %cst_24 = arith.constant dense<0.000000e+00> : vector<8x8xf32>
    %28 = tpu.matmul %1, %27, %cst_24 {dimension_numbers = #tpu.dot_dimension_numbers<[1], [0], [0], [1], [0, 0, 1, 1], [], []>, precision = #tpu.contract_precision<fp32>} : vector<8x16xf32>, vector<16x8xf32>, vector<8x8xf32> -> vector<8x8xf32>
    %c2_25 = arith.constant 2 : index
    %c0_26 = arith.constant 0 : index
    %c0_27 = arith.constant 0 : index
    %29 = vector.load %arg3[%c2_25, %c0_26, %c0_27] : memref<4x1x8xf32, #tpu.memory_space<vmem>>, vector<1x1x8xf32>
    %30 = vector.shape_cast %29 : vector<1x1x8xf32> to vector<1x8xf32>
    %31 = vector.broadcast %30 : vector<1x8xf32> to vector<8x8xf32>
    %32 = arith.addf %28, %31 : vector<8x8xf32>
    %cst_28 = arith.constant 0.000000e+00 : f32
    %33 = vector.broadcast %cst_28 : f32 to vector<8x8xf32>
    %34 = arith.maximumf %32, %33 : vector<8x8xf32>
    %c2_29 = arith.constant 2 : index
    %c0_30 = arith.constant 0 : index
    %c0_31 = arith.constant 0 : index
    %35 = vector.load %arg4[%c2_29, %c0_30, %c0_31] : memref<4x8x8xf32, #tpu.memory_space<vmem>>, vector<1x8x8xf32>
    %36 = vector.shape_cast %35 : vector<1x8x8xf32> to vector<8x8xf32>
    %37 = arith.addf %34, %36 : vector<8x8xf32>
    %c3 = arith.constant 3 : index
    %c0_32 = arith.constant 0 : index
    %c0_33 = arith.constant 0 : index
    %38 = vector.load %arg2[%c3, %c0_32, %c0_33] : memref<4x16x8xf32, #tpu.memory_space<vmem>>, vector<1x16x8xf32>
    %39 = vector.shape_cast %38 : vector<1x16x8xf32> to vector<16x8xf32>
    %cst_34 = arith.constant dense<0.000000e+00> : vector<8x8xf32>
    %40 = tpu.matmul %1, %39, %cst_34 {dimension_numbers = #tpu.dot_dimension_numbers<[1], [0], [0], [1], [0, 0, 1, 1], [], []>, precision = #tpu.contract_precision<fp32>} : vector<8x16xf32>, vector<16x8xf32>, vector<8x8xf32> -> vector<8x8xf32>
    %c3_35 = arith.constant 3 : index
    %c0_36 = arith.constant 0 : index
    %c0_37 = arith.constant 0 : index
    %41 = vector.load %arg3[%c3_35, %c0_36, %c0_37] : memref<4x1x8xf32, #tpu.memory_space<vmem>>, vector<1x1x8xf32>
    %42 = vector.shape_cast %41 : vector<1x1x8xf32> to vector<1x8xf32>
    %43 = vector.broadcast %42 : vector<1x8xf32> to vector<8x8xf32>
    %44 = arith.addf %40, %43 : vector<8x8xf32>
    %cst_38 = arith.constant 0.000000e+00 : f32
    %45 = vector.broadcast %cst_38 : f32 to vector<8x8xf32>
    %46 = arith.maximumf %44, %45 : vector<8x8xf32>
    %c3_39 = arith.constant 3 : index
    %c0_40 = arith.constant 0 : index
    %c0_41 = arith.constant 0 : index
    %47 = vector.load %arg4[%c3_39, %c0_40, %c0_41] : memref<4x8x8xf32, #tpu.memory_space<vmem>>, vector<1x8x8xf32>
    %48 = vector.shape_cast %47 : vector<1x8x8xf32> to vector<8x8xf32>
    %49 = arith.addf %46, %48 : vector<8x8xf32>
    %50 = tpu.concatenate %13, %25, %37, %49 in 0 : vector<8x8xf32>, vector<8x8xf32>, vector<8x8xf32>, vector<8x8xf32> -> vector<32x8xf32>
    %c0_42 = arith.constant 0 : index
    %c0_43 = arith.constant 0 : index
    %c0_44 = arith.constant 0 : index
    %51 = vector.load %arg5[%c0_42, %c0_43, %c0_44] : memref<2x16x32xf32, #tpu.memory_space<vmem>>, vector<1x16x32xf32>
    %52 = vector.shape_cast %51 : vector<1x16x32xf32> to vector<16x32xf32>
    %cst_45 = arith.constant dense<0.000000e+00> : vector<16x8xf32>
    %53 = tpu.matmul %52, %50, %cst_45 {dimension_numbers = #tpu.dot_dimension_numbers<[1], [0], [0], [1], [0, 0, 1, 1], [], []>, precision = #tpu.contract_precision<fp32>} : vector<16x32xf32>, vector<32x8xf32>, vector<16x8xf32> -> vector<16x8xf32>
    %c0_46 = arith.constant 0 : index
    %c0_47 = arith.constant 0 : index
    %c0_48 = arith.constant 0 : index
    %54 = vector.load %arg6[%c0_46, %c0_47, %c0_48] : memref<2x8x32xf32, #tpu.memory_space<vmem>>, vector<1x8x32xf32>
    %55 = vector.shape_cast %54 : vector<1x8x32xf32> to vector<8x32xf32>
    %cst_49 = arith.constant dense<0.000000e+00> : vector<16x32xf32>
    %56 = tpu.matmul %53, %55, %cst_49 {dimension_numbers = #tpu.dot_dimension_numbers<[1], [0], [0], [1], [0, 0, 1, 1], [], []>, precision = #tpu.contract_precision<fp32>} : vector<16x8xf32>, vector<8x32xf32>, vector<16x32xf32> -> vector<16x32xf32>
    %c1_50 = arith.constant 1 : index
    %c0_51 = arith.constant 0 : index
    %c0_52 = arith.constant 0 : index
    %57 = vector.load %arg5[%c1_50, %c0_51, %c0_52] : memref<2x16x32xf32, #tpu.memory_space<vmem>>, vector<1x16x32xf32>
    %58 = vector.shape_cast %57 : vector<1x16x32xf32> to vector<16x32xf32>
    %cst_53 = arith.constant dense<0.000000e+00> : vector<16x8xf32>
    %59 = tpu.matmul %58, %50, %cst_53 {dimension_numbers = #tpu.dot_dimension_numbers<[1], [0], [0], [1], [0, 0, 1, 1], [], []>, precision = #tpu.contract_precision<fp32>} : vector<16x32xf32>, vector<32x8xf32>, vector<16x8xf32> -> vector<16x8xf32>
    %c1_54 = arith.constant 1 : index
    %c0_55 = arith.constant 0 : index
    %c0_56 = arith.constant 0 : index
    %60 = vector.load %arg6[%c1_54, %c0_55, %c0_56] : memref<2x8x32xf32, #tpu.memory_space<vmem>>, vector<1x8x32xf32>
    %61 = vector.shape_cast %60 : vector<1x8x32xf32> to vector<8x32xf32>
    %cst_57 = arith.constant dense<0.000000e+00> : vector<16x32xf32>
    %62 = tpu.matmul %59, %61, %cst_57 {dimension_numbers = #tpu.dot_dimension_numbers<[1], [0], [0], [1], [0, 0, 1, 1], [], []>, precision = #tpu.contract_precision<fp32>} : vector<16x8xf32>, vector<8x32xf32>, vector<16x32xf32> -> vector<16x32xf32>
    %63 = arith.addf %56, %62 : vector<16x32xf32>
    %c0_58 = arith.constant 0 : index
    %c0_59 = arith.constant 0 : index
    %64 = vector.load %arg7[%c0_58, %c0_59] : memref<1x32xf32, #tpu.memory_space<vmem>>, vector<1x32xf32>
    %65 = vector.broadcast %64 : vector<1x32xf32> to vector<16x32xf32>
    %66 = arith.addf %63, %65 : vector<16x32xf32>
    %cst_60 = arith.constant 0.000000e+00 : f32
    %67 = vector.broadcast %cst_60 : f32 to vector<16x32xf32>
    %68 = arith.maximumf %66, %67 : vector<16x32xf32>
    %c0_61 = arith.constant 0 : index
    %c0_62 = arith.constant 0 : index
    %c0_63 = arith.constant 0 : index
    %69 = vector.load %arg8[%c0_61, %c0_62, %c0_63] : memref<1x16x32xf32, #tpu.memory_space<vmem>>, vector<1x16x32xf32>
    %70 = vector.shape_cast %69 : vector<1x16x32xf32> to vector<16x32xf32>
    %71 = vector.shape_cast %68 : vector<16x32xf32> to vector<1x16x32xf32>
    tpu.vector_store %arg8[%c0_61, %c0_62, %c0_63], %71 {strides = array<i32>} : memref<1x16x32xf32, #tpu.memory_space<vmem>>, vector<1x16x32xf32>,
    return
  }
  func.func @transform_0(%arg0: i32) -> (i32, i32, i32) {
    %c0_i32 = arith.constant 0 : i32
    %c0_i32_0 = arith.constant 0 : i32
    %c0_i32_1 = arith.constant 0 : i32
    return %arg0, %c0_i32, %c0_i32_0 : i32, i32, i32
  }
  func.func @transform_1(%arg0: i32) -> (i32, i32, i32) {
    %c0_i32 = arith.constant 0 : i32
    %c0_i32_0 = arith.constant 0 : i32
    %c0_i32_1 = arith.constant 0 : i32
    %c0_i32_2 = arith.constant 0 : i32
    return %c0_i32, %c0_i32_0, %c0_i32_1 : i32, i32, i32
  }
  func.func @transform_2(%arg0: i32) -> (i32, i32, i32) {
    %c0_i32 = arith.constant 0 : i32
    %c0_i32_0 = arith.constant 0 : i32
    %c0_i32_1 = arith.constant 0 : i32
    %c0_i32_2 = arith.constant 0 : i32
    return %c0_i32, %c0_i32_0, %c0_i32_1 : i32, i32, i32
  }
  func.func @transform_3(%arg0: i32) -> (i32, i32, i32) {
    %c0_i32 = arith.constant 0 : i32
    %c0_i32_0 = arith.constant 0 : i32
    %c0_i32_1 = arith.constant 0 : i32
    %c0_i32_2 = arith.constant 0 : i32
    return %c0_i32, %c0_i32_0, %c0_i32_1 : i32, i32, i32
  }
  func.func @transform_4(%arg0: i32) -> (i32, i32, i32) {
    %c0_i32 = arith.constant 0 : i32
    %c0_i32_0 = arith.constant 0 : i32
    %c0_i32_1 = arith.constant 0 : i32
    %c0_i32_2 = arith.constant 0 : i32
    return %c0_i32, %c0_i32_0, %c0_i32_1 : i32, i32, i32
  }
  func.func @transform_5(%arg0: i32) -> (i32, i32, i32) {
    %c0_i32 = arith.constant 0 : i32
    %c0_i32_0 = arith.constant 0 : i32
    %c0_i32_1 = arith.constant 0 : i32
    %c0_i32_2 = arith.constant 0 : i32
    return %c0_i32, %c0_i32_0, %c0_i32_1 : i32, i32, i32
  }
  func.func @transform_6(%arg0: i32) -> (i32, i32) {
    %c0_i32 = arith.constant 0 : i32
    %c0_i32_0 = arith.constant 0 : i32
    %c0_i32_1 = arith.constant 0 : i32
    return %c0_i32, %c0_i32_0 : i32, i32
  }
  func.func @transform_7(%arg0: i32) -> (i32, i32, i32) {
    %c0_i32 = arith.constant 0 : i32
    %c0_i32_0 = arith.constant 0 : i32
    %c0_i32_1 = arith.constant 0 : i32
    return %arg0, %c0_i32, %c0_i32_0 : i32, i32, i32
  }
}

</mosaic_0001>

<bundles_post_ra>
// kernel: lma_initial_transform_rl.1
= control target key start
LH: loop header
LB: loop body
LE: loop exit
PB: predicated region body
PF: predicated region fallthrough
CT: control target
= control target key end

     0   :  { %12 = vsyncpa [#allocation3], 0  ;;  %s5729_s0 = inlined_call_operand.vmem [shape: f32[2,8,16], index: 0, kind: input, shape index: {}]   ;;  %s5730_s1 = inlined_call_operand.vmem [shape: f32[4,16,8], index: 1, kind: input, shape index: {}]   ;;  %s5731_s2 = inlined_call_operand.vmem [shape: f32[4,1,8], index: 2, kind: input, shape index: {}]   ;;  %s5732_s3 = inlined_call_operand.vmem [shape: f32[4,8,8], index: 3, kind: input, shape index: {}]   ;;  %s5733_s4 = inlined_call_operand.vmem [shape: f32[2,16,32], index: 4, kind: input, shape index: {}]   ;;  %s5734_s5 = inlined_call_operand.vmem [shape: f32[2,8,32], index: 5, kind: input, shape index: {}]   ;;  %s5735_s6 = inlined_call_operand.vmem [shape: f32[1,32], index: 6, kind: input, shape index: {}]   ;;  %s5736_s7 = inlined_call_operand.hbm [shape: f32[2,16,32], index: 7, kind: output, shape index: {}]  }
   0x1   :  { %14 = vsyncpa [#allocation3 + $0x1], 0  ;;  %s5309_s24 = smov 0   ;;  %s5311_s25 = smov 0  }
   0x2   :  { %s5313_s26 = smov 0   ;;  %s5315_s27 = smov 0  }
   0x3 LB: > { %s5330_s28 = sadd.s32 4294967295, %s5261_s27   ;;  %s4329_s29 = sadd.s32 4294967294, %s5261_s27   ;;  %s5261_s27 = sphi %s5315_s27, %s5742_s27   ;;  %s5257_s26 = sphi %s5313_s26, %s5741_s26   ;;  %s5253_s25 = sphi %s5311_s25, %s5740_s25   ;;  %s5249_s24 = sphi %s5309_s24, %s5739_s24  }
   0x4   : > { %s5334_s30 = sadd.s32 1, %s5261_s27   ;;  %s179_s8 = sadd.s32 1, %s5257_s26 }
   0x5   : > { %s176_s9 = ssub.s32 %s5261_s27, %s5334_s30  ;;  %p189_p0 = scmp.ne.s32.totalorder %s5257_s26, %s5253_s25 }
   0x6   : > { %p177_p1 = scmp.eq.s32.totalorder %s176_s9, 0  ;;  %p190_p2 = scmp.eq.s32.totalorder %s5330_s28, 1 }
   0x7   : > { %p195_p3 = scmp.ne.s32.totalorder %s5253_s25, %s5249_s24  ;;  %p196_p4 = scmp.eq.s32.totalorder %s4329_s29, 1 }
   0x8   : > { %s5345_s10 = scalar_select %p177_p1, %s5257_s26, %s179_s8  }
   0x9   : > { %p5347_p5 = por %p190_p2, %p189_p0  ;;  %p5351_p6 = por %p196_p4, %p195_p3 }
   0xa   : > { %p4332_p7 = scmp.ge.s32.totalorder %s5261_s27, 1  ;;  %p239_p8 = scmp.lt.s32.totalorder %s5261_s27, 3 }
   0xc   : > { %p240_p9 = pnand %p4332_p7, %p239_p8 }
   0xd   : > { %v275_v0 = vld [vmem:[%s5730_s1] sm:$0xff] (!%p240_p9)  ;;  %v276_v1 = vld [vmem:[%s5730_s1 + $0x8] sm:$0xff] (!%p240_p9)  ;;  %v4336_v2 = vld [vmem:[%s5730_s1 + $0x10] sm:$0xff] (!%p240_p9)  ;;  %v5263_v3 = vmov (!%p240_p9), 0.0|0.0   ;;  %p270_p10 = scmp.lt.s32.totalorder (!%p240_p9), %s5330_s28, 1  ;;  %vm5264_vm0 = vmmov (!%p240_p9), 0  }
   0xe   : > { %243 = sbr.rel (%p240_p9) target bundleno = 956 (0x3bc), region = 48  ;;  %4901 = vmatprep.subr.bf16.mxu0 (!%p240_p9), %v5263_v3  ;;  %4919 = vmatprep.subr.bf16.mxu1 (!%p240_p9), %v5263_v3  ;;  %v289_v4 = vand.u32 (!%p240_p9), 4294901760, %v275_v0  ;;  %v292_v5 = vand.u32 (!%p240_p9), 4294901760, %v276_v1  ;;  %v4337_v6 = vld [vmem:[%s5730_s1 + $0x18] sm:$0xff] (!%p240_p9)  ;;  %v762_v7 = vand.u32 (!%p240_p9), 4294901760, %v4336_v2  ;;  %v5265_v9 = vmov (!%p240_p9), 0.0  }
   0xf   : > { %v765_v8 = vand.u32 (!%p240_p9), 4294901760, %v4337_v6  ;;  %4545 = vmatprep.mubr.msk.f32.mxu0 (!%p240_p9), %vm5264_vm0, %v5265_v9  ;;  %4587 = vmatprep.mubr.msk.f32.mxu1 (!%p240_p9), %vm5264_vm0, %v5265_v9  ;;  %vm284_vm1 = vcmask (!%p240_p9), 130048   ;;  %v4341_v39 = vld [vmem:[%s5730_s1 + $0x20] sm:$0xff] (!%p240_p9)  ;;  %v4342_v40 = vld [vmem:[%s5730_s1 + $0x28] sm:$0xff] (!%p240_p9)  ;;  %v4346_v41 = vld [vmem:[%s5730_s1 + $0x30] sm:$0xff] (!%p240_p9)  ;;  %vm2174_vm2 = vcmask (!%p240_p9), 261120  }
  0x10   : > { %v5376_v10 = vpack.c.bf16 (!%p240_p9), %v292_v5, %v289_v4  ;;  %v5378_v11 = vsub.f32 (!%p240_p9), %v275_v0, %v289_v4  ;;  %v5380_v12 = vsub.f32 (!%p240_p9), %v276_v1, %v292_v5  ;;  %v5382_v13 = vsub.f32 (!%p240_p9), %v4336_v2, %v762_v7  ;;  %v4347_v42 = vld [vmem:[%s5730_s1 + $0x38] sm:$0xff] (!%p240_p9)  ;;  %s267_s20 = sand.u32 (!%p240_p9), 1, %s5253_s25   ;;  %s4360_s9 = sshll.u32 (!%p240_p9), %s5330_s28, 8 }
  0x11   : > { %v5385_v14 = vpack.c.bf16 (!%p240_p9), %v765_v8, %v762_v7  ;;  %v5387_v15 = vsub.f32 (!%p240_p9), %v4337_v6, %v765_v8  ;;  %v1236_v43 = vand.u32 (!%p240_p9), 4294901760, %v4341_v39  ;;  %v1239_v44 = vand.u32 (!%p240_p9), 4294901760, %v4342_v40  ;;  %s5684_s15 = scalar_lea.hbm (!%p240_p9), %s5736_s7, %s4360_s9  ;;  %s5266_s17 = smov (!%p240_p9), [#allocation2]  }
  0x12   : > { %4903 = vmatpush3.bf16.msra.mxu0 (!%p240_p9), %v5376_v10  ;;  %v368_v16 = vand.u32 (!%p240_p9), 4294901760, %v5378_v11  ;;  %v375_v17 = vand.u32 (!%p240_p9), 4294901760, %v5380_v12  ;;  %v841_v18 = vand.u32 (!%p240_p9), 4294901760, %v5382_v13  ;;  %v4908_v37 = vpack.c.bf16 (!%p240_p9), %v5380_v12, %v5378_v11  ;;  %s5203_s18 = sshll.u32 (!%p240_p9), %s5266_s17, 4  ;;  %s5204_s18 = int_to_ptr.vmem [resolvable:$false] %s5203_s18 }
  0x13   : > { %4921 = vmatpush3.bf16.msra.mxu1 (!%p240_p9), %v5385_v14  ;;  %4904 = vmatprep.subr.bf16.mxu0 (!%p240_p9), %v5263_v3  ;;  %v848_v19 = vand.u32 (!%p240_p9), 4294901760, %v5387_v15  ;;  %v4926_v38 = vpack.c.bf16 (!%p240_p9), %v5387_v15, %v5382_v13  ;;  %v1710_v47 = vand.u32 (!%p240_p9), 4294901760, %v4346_v41  ;;  %v1713_v48 = vand.u32 (!%p240_p9), 4294901760, %v4347_v42  ;;  %s5205_s19 = scalar_lea.vmem (!%p240_p9), %s5204_s18, 512 }
  0x14   : > { %4922 = vmatprep.subr.bf16.mxu1 (!%p240_p9), %v5263_v3  ;;  %v369_v21 = vsub.f32 (!%p240_p9), %v5378_v11, %v368_v16  ;;  %v376_v23 = vsub.f32 (!%p240_p9), %v5380_v12, %v375_v17  ;;  %v842_v24 = vsub.f32 (!%p240_p9), %v5382_v13, %v841_v18  ;;  %v4914_v45 = vpack.c.bf16 (!%p240_p9), %v375_v17, %v368_v16  ;;  %v4335_v16 = vld [vmem:[%s5731_s2] ss:$0 sm:$0xff] (!%p240_p9)  ;;  %v4339_v17 = vld [vmem:[%s5731_s2 + $0x1] ss:$0 sm:$0xff] (!%p240_p9) }
  0x15   : > { %s271_s21 = scalar_select %p270_p10, %s5330_s28, 1  ;;  %v849_v25 = vsub.f32 %v5387_v15, %v848_v19  ;;  %v4932_v46 = vpack.c.bf16 %v848_v19, %v841_v18  ;;  %v5460_v49 = vsub.f32 %v4341_v39, %v1236_v43  ;;  %v5462_v50 = vsub.f32 %v4342_v40, %v1239_v44 }
  0x16   : > { %v370_v28 = vand.u32 4294901760, %v369_v21  ;;  %v377_v29 = vand.u32 4294901760, %v376_v23  ;;  %v843_v30 = vand.u32 4294901760, %v842_v24  ;;  %v5464_v51 = vsub.f32 %v4346_v41, %v1710_v47  ;;  %v748_v24 = vld [vmem:[%s5732_s3] sm:$0xff]  ;;  %s5688_s28 = scalar_lea.sflag [#allocation3], %s267_s20 }
  0x17   : > { %s4334_s22 = sshll.u32 %s271_s21, 3  ;;  %v850_v31 = vand.u32 4294901760, %v849_v25  ;;  %v5466_v52 = vsub.f32 %v4347_v42, %v1713_v48  ;;  %v1315_v53 = vand.u32 4294901760, %v5460_v49  ;;  %v1322_v54 = vand.u32 4294901760, %v5462_v50  ;;  %v4340_v25 = vld [vmem:[%s5732_s3 + $0x8] sm:$0xff]  ;;  %s4333_s21 = sshll.u32 %s267_s20, 4 }
  0x18   : > { %s273_s8 = scalar_lea.vmem %s5729_s0, %s4334_s22  ;;  %v4905_v34 = vpack.c.bf16 %v377_v29, %v370_v28  ;;  %v1789_v55 = vand.u32 4294901760, %v5464_v51  ;;  %v4938_v61 = vpack.c.bf16 %v1239_v44, %v1236_v43  ;;  %v4956_v62 = vpack.c.bf16 %v1713_v48, %v1710_v47  ;;  %v2173_v44 = vld [vmem:[%s5733_s4 + $0x8] sm:$0xff]  ;;  %v4344_v47 = vld [vmem:[%s5731_s2 + $0x2] ss:$0 sm:$0xff]  ;;  %v4349_v48 = vld [vmem:[%s5731_s2 + $0x3] ss:$0 sm:$0xff] }
  0x19   : > { %v274_v20 = vld [vmem:[%s273_s8] sm:$0xff]  ;;  %v4923_v35 = vpack.c.bf16 %v850_v31, %v843_v30  ;;  %v1796_v56 = vand.u32 4294901760, %v5466_v52  ;;  %v1316_v57 = vsub.f32 %v5460_v49, %v1315_v53  ;;  %v1323_v58 = vsub.f32 %v5462_v50, %v1322_v54  ;;  %s269_s29 = scalar_lea.vmem [#allocation2], %s4333_s21 }
  0x1a   : > { %v286_v22 = vsel %vm284_vm1, %v274_v20, 0  ;;  %v1790_v59 = vsub.f32 %v5464_v51, %v1789_v55  ;;  %v4944_v6 = vpack.c.bf16 %v5462_v50, %v5460_v49  ;;  %v4962_v7 = vpack.c.bf16 %v5466_v52, %v5464_v51  ;;  %s4267_s8 = sshll.u32 %s269_s29, 4  ;;  %s5679_s8 = int_to_ptr.vmem [resolvable:$true] %s4267_s8 }
  0x1b   : > { %v5404_v26 = vand.u32 4294901760, %v286_v22  ;;  %v1797_v60 = vsub.f32 %v5466_v52, %v1796_v56  ;;  %v1317_v63 = vand.u32 4294901760, %v1316_v57  ;;  %v1324_v0 = vand.u32 4294901760, %v1323_v58  ;;  %v4350_v57 = vld [vmem:[%s5732_s3 + $0x18] sm:$0xff]  ;;  %s5199_s16 = scalar_lea.vmem %s5679_s8, 256  ;;  %p5206_p0 = scmp.lt.s32.totalorder %s5679_s8, %s5204_s18 }
  0x1c   : > { %v1791_v1 = vand.u32 4294901760, %v1790_v59  ;;  %v4950_v8 = vpack.c.bf16 %v1322_v54, %v1315_v53  ;;  %vm3249_vm3 = vcmask 64512   ;;  %p5200_p11 = scmp.ne.s32.totalorder %s5679_s8, %s5199_s16  ;;  %p5207_p1 = scmp.lt.s32.totalorder %s5205_s19, %s5199_s16 }
  0x1d   : > { %v5407_v27 = vsub.f32 %v286_v22, %v5404_v26  ;;  %v1798_v2 = vand.u32 4294901760, %v1797_v60  ;;  %v4941_v4 = vpack.c.bf16 %v1324_v0, %v1317_v63  ;;  %v4351_v63 = vld [vmem:[%s5733_s4 + $0x10] sm:$0xff] }
  0x1e   : > { %p5201_p12 = pnand %p5200_p11, %p5347_p5  ;;  %p5208_p2 = por %p5207_p1, %p5206_p0 }
  0x1f   : > { %v5410_v32 = vand.u32 4294901760, %v5407_v27  ;;  %v4959_v5 = vpack.c.bf16 %v1798_v2, %v1791_v1 }
  0x20   : > { %p5202_p13 = pneg %p5201_p12 }
  0x21   : > { %v358_v33 = vsub.f32 %v5407_v27, %v5410_v32 }
  0x22   : > { %p5209_p3 = pnand %p5208_p2, %p5202_p13 }
  0x23   : > { %v5414_v36 = vand.u32 4294901760, %v358_v33 }
  0x25   : > { %4546 = vmatmul.mubr.f32.vlgmr.msra.gmra.mrb[0].mxu0 %v5414_v36  ;;  %4588 = vmatmul.mubr.f32.vlgmr.msra.gmra.mrb[0].mxu1 %v5414_v36 }
  0x26   : > { %4906 = vmatpush3.bf16.msra.mxu0 %v4905_v34  ;;  %4924 = vmatpush3.bf16.msra.mxu1 %v4923_v35 }
  0x27   : > { %4552 = vmatprep.mubr.msk.f32.mxu0 %vm5264_vm0, %v5265_v9  ;;  %4594 = vmatprep.mubr.msk.f32.mxu1 %vm5264_vm0, %v5265_v9 }
  0x28   : > { %4907 = vmatprep.subr.bf16.mxu0 %v5263_v3  ;;  %4925 = vmatprep.subr.bf16.mxu1 %v5263_v3 }
  0x2d   : > { %4553 = vmatmul.mubr.f32.vlgmr.msra.gmra.mrb[0].mxu0 %v5404_v26  ;;  %4595 = vmatmul.mubr.f32.vlgmr.msra.gmra.mrb[0].mxu1 %v5404_v26 }
  0x2e   : > { %4909 = vmatpush3.bf16.msra.mxu0 %v4908_v37  ;;  %4927 = vmatpush3.bf16.msra.mxu1 %v4926_v38 }
  0x2f   : > { %4559 = vmatprep.mubr.msk.f32.mxu0 %vm5264_vm0, %v5265_v9  ;;  %4601 = vmatprep.mubr.msk.f32.mxu1 %vm5264_vm0, %v5265_v9 }
  0x30   : > { %4910 = vmatprep.subr.bf16.mxu0 %v5263_v3  ;;  %4928 = vmatprep.subr.bf16.mxu1 %v5263_v3 }
  0x35   : > { %4560 = vmatmul.mubr.f32.vlgmr.msra.gmra.mrb[0].mxu0 %v5407_v27  ;;  %4602 = vmatmul.mubr.f32.vlgmr.msra.gmra.mrb[0].mxu1 %v5407_v27 }
  0x36   : > { %4912 = vmatpush3.bf16.msra.mxu0 %v5376_v10  ;;  %4930 = vmatpush3.bf16.msra.mxu1 %v5385_v14 }
  0x37   : > { %4566 = vmatprep.mubr.msk.f32.mxu0 %vm5264_vm0, %v5265_v9  ;;  %4608 = vmatprep.mubr.msk.f32.mxu1 %vm5264_vm0, %v5265_v9 }
  0x38   : > { %4913 = vmatprep.subr.bf16.mxu0 %v5263_v3  ;;  %4931 = vmatprep.subr.bf16.mxu1 %v5263_v3 }
  0x3d   : > { %4567 = vmatmul.mubr.f32.vlgmr.msra.gmra.mrb[0].mxu0 %v5410_v32  ;;  %4609 = vmatmul.mubr.f32.vlgmr.msra.gmra.mrb[0].mxu1 %v5410_v32 }
  0x3e   : > { %4915 = vmatpush3.bf16.msra.mxu0 %v4914_v45  ;;  %4933 = vmatpush3.bf16.msra.mxu1 %v4932_v46  ;;  %v2179_v45 = vsel %vm2174_vm2, %v2173_v44, 0 }
  0x3f   : > { %4573 = vmatprep.mubr.msk.f32.mxu0 %vm5264_vm0, %v5265_v9  ;;  %4615 = vmatprep.mubr.msk.f32.mxu1 %vm5264_vm0, %v5265_v9  ;;  %v5583_v46 = vand.u32 4294901760, %v2179_v45 }
  0x40   : > { %4916 = vmatprep.subr.bf16.mxu0 %v5263_v3  ;;  %4934 = vmatprep.subr.bf16.mxu1 %v5263_v3 }
  0x41   : > { %v5592_v49 = vsub.f32 %v2179_v45, %v5583_v46 }
  0x43   : > { %v2262_v60 = vand.u32 4294901760, %v5592_v49 }
  0x45   : > { %4574 = vmatmul.mubr.f32.vlgmr.msra.gmra.mrb[0].mxu0 %v5404_v26  ;;  %4616 = vmatmul.mubr.f32.vlgmr.msra.gmra.mrb[0].mxu1 %v5404_v26  ;;  %v2263_v2 = vsub.f32 %v5592_v49, %v2262_v60 }
  0x46   : > { %4918 = vmatpush3.bf16.msra.mxu0 %v5376_v10  ;;  %4936 = vmatpush3.bf16.msra.mxu1 %v5385_v14  ;;  %v4968_v10 = vpack.c.bf16 %v1796_v56, %v1789_v55  ;;  %v4345_v56 = vld [vmem:[%s5732_s3 + $0x10] sm:$0xff] }
  0x47   : > { %4580 = vmatprep.mubr.msk.f32.mxu0 %vm5264_vm0, %v5265_v9  ;;  %4622 = vmatprep.mubr.msk.f32.mxu1 %vm5264_vm0, %v5265_v9 }
  0x48   : > { %4937 = vmatprep.subr.bf16.mxu0 %v5263_v3  ;;  %4955 = vmatprep.subr.bf16.mxu1 %v5263_v3 }
  0x4d   : > { %4581 = vmatmul.mubr.f32.vlgmr.msra.gmra.mrb[0].mxu0 %v5404_v26  ;;  %4623 = vmatmul.mubr.f32.vlgmr.msra.gmra.mrb[0].mxu1 %v5404_v26 }
  0x4e   : > { %4939 = vmatpush3.bf16.msra.mxu0 %v4938_v61  ;;  %4957 = vmatpush3.bf16.msra.mxu1 %v4956_v62 }
  0x4f   : > { %4629 = vmatprep.mubr.msk.f32.mxu0 %vm5264_vm0, %v5265_v9  ;;  %4671 = vmatprep.mubr.msk.f32.mxu1 %vm5264_vm0, %v5265_v9 }
  0x50   : > { %4940 = vmatprep.subr.bf16.mxu0 %v5263_v3  ;;  %4958 = vmatprep.subr.bf16.mxu1 %v5263_v3 }
  0x51   : > { %4630 = vmatmul.mubr.f32.vlgmr.msra.gmra.mrb[2].mxu0 %v5414_v36  ;;  %4672 = vmatmul.mubr.f32.vlgmr.msra.gmra.mrb[2].mxu1 %v5414_v36 }
  0x52   : > { %4942 = vmatpush3.bf16.msra.mxu0 %v4941_v4  ;;  %4960 = vmatpush3.bf16.msra.mxu1 %v4959_v5 }
  0x53   : > { %4636 = vmatprep.mubr.msk.f32.mxu0 %vm5264_vm0, %v5265_v9  ;;  %4678 = vmatprep.mubr.msk.f32.mxu1 %vm5264_vm0, %v5265_v9 }
  0x54   : > { %4943 = vmatprep.subr.bf16.mxu0 %v5263_v3  ;;  %4961 = vmatprep.subr.bf16.mxu1 %v5263_v3 }
  0x59   : > { %4637 = vmatmul.mubr.f32.vlgmr.msra.gmra.mrb[2].mxu0 %v5404_v26  ;;  %4679 = vmatmul.mubr.f32.vlgmr.msra.gmra.mrb[2].mxu1 %v5404_v26 }
  0x5a   : > { %4945 = vmatpush3.bf16.msra.mxu0 %v4944_v6  ;;  %4963 = vmatpush3.bf16.msra.mxu1 %v4962_v7  ;;  %v2714_v7 = vsel %vm2174_vm2, %v4351_v63, 0 }
  0x5b   : > { %4643 = vmatprep.mubr.msk.f32.mxu0 %vm5264_vm0, %v5265_v9  ;;  %4685 = vmatprep.mubr.msk.f32.mxu1 %vm5264_vm0, %v5265_v9 }
  0x5c   : > { %4946 = vmatprep.subr.bf16.mxu0 %v5263_v3  ;;  %4964 = vmatprep.subr.bf16.mxu1 %v5263_v3 }
  0x61   : > { %4644 = vmatmul.mubr.f32.vlgmr.msra.gmra.mrb[2].mxu0 %v5407_v27  ;;  %4686 = vmatmul.mubr.f32.vlgmr.msra.gmra.mrb[2].mxu1 %v5407_v27 }
  0x62   : > { %4948 = vmatpush3.bf16.msra.mxu0 %v4938_v61  ;;  %4966 = vmatpush3.bf16.msra.mxu1 %v4956_v62 }
  0x63   : > { %4650 = vmatprep.mubr.msk.f32.mxu0 %vm5264_vm0, %v5265_v9  ;;  %4692 = vmatprep.mubr.msk.f32.mxu1 %vm5264_vm0, %v5265_v9 }
  0x64   : > { %4949 = vmatprep.subr.bf16.mxu0 %v5263_v3  ;;  %4967 = vmatprep.subr.bf16.mxu1 %v5263_v3 }
  0x69   : > { %4651 = vmatmul.mubr.f32.vlgmr.msra.gmra.mrb[2].mxu0 %v5410_v32  ;;  %4693 = vmatmul.mubr.f32.vlgmr.msra.gmra.mrb[2].mxu1 %v5410_v32 }
  0x6a   : > { %4951 = vmatpush3.bf16.msra.mxu0 %v4950_v8  ;;  %4969 = vmatpush3.bf16.msra.mxu1 %v4968_v10 }
  0x6b   : > { %4657 = vmatprep.mubr.msk.f32.mxu0 %vm5264_vm0, %v5265_v9  ;;  %4699 = vmatprep.mubr.msk.f32.mxu1 %vm5264_vm0, %v5265_v9 }
  0x6c   : > { %4952 = vmatprep.subr.bf16.mxu0 %v5263_v3  ;;  %4970 = vmatprep.subr.bf16.mxu1 %v5263_v3  ;;  %v2172_v3 = vld [vmem:[%s5733_s4] sm:$0xff] }
  0x6d   : > { %v2176_v11 = vsel %vm2174_vm2, %v2172_v3, 0  ;;  %v2264_v3 = vand.u32 4294901760, %v2263_v2 }
  0x6e   : > { %v5548_v12 = vand.u32 4294901760, %v2176_v11 }
  0x70   : > { %v5551_v13 = vsub.f32 %v2176_v11, %v5548_v12 }
  0x71   : > { %4658 = vmatmul.mubr.f32.vlgmr.msra.gmra.mrb[2].mxu0 %v5404_v26  ;;  %4700 = vmatmul.mubr.f32.vlgmr.msra.gmra.mrb[2].mxu1 %v5404_v26 }
  0x72   : > { %4954 = vmatpush3.bf16.msra.mxu0 %v4938_v61  ;;  %4972 = vmatpush3.bf16.msra.mxu1 %v4956_v62  ;;  %v2252_v14 = vand.u32 4294901760, %v5551_v13 }
  0x73   : > { %4664 = vmatprep.mubr.msk.f32.mxu0 %vm5264_vm0, %v5265_v9  ;;  %4706 = vmatprep.mubr.msk.f32.mxu1 %vm5264_vm0, %v5265_v9 }
  0x74   : > { %v2253_v9 = vsub.f32 %v5551_v13, %v2252_v14 }
  0x76   : > { %v2254_v15 = vand.u32 4294901760, %v2253_v9 }
  0x79   : > { %4665 = vmatmul.mubr.f32.vlgmr.msra.gmra.mrb[2].mxu0 %v5404_v26  ;;  %4707 = vmatmul.mubr.f32.vlgmr.msra.gmra.mrb[2].mxu1 %v5404_v26 }
  0x7a   : > { %4750 = vmatprep.mubr.f32.mxu0 %v2252_v14  ;;  %4717 = vmatprep.mubr.f32.mxu1 %v2254_v15  ;;  %v5612_v14 = vand.u32 4294901760, %v2714_v7 }
 0x120   : > { %v743_v18 = vpop.f32.mrb[0].mxu0  ;;  %v1216_v19 = vpop.f32.mrb[0].mxu1 }
 0x121   : > { %v5069_v20 = vadd.f32 %v4335_v16, %v743_v18  ;;  %v5070_v21 = vadd.f32 %v4339_v17, %v1216_v19  ;;  %v4582_v22 = vpop.f32.mrb[1].mxu0  ;;  %v4624_v23 = vpop.f32.mrb[1].mxu1  ;;  %v4352_v17 = vld [vmem:[%s5733_s4 + $0x18] sm:$0xff] }
 0x123   : > { %v747_v26 = vmax.f32 %v5069_v20, 0.0  ;;  %v1220_v27 = vmax.f32 %v5070_v21, 0.0  ;;  %v2789_v20 = vsub.f32 %v2714_v7, %v5612_v14  ;;  %v2717_v21 = vsel %vm2174_vm2, %v4352_v17, 0 }
 0x124   : > { %v2798_v23 = vand.u32 4294901760, %v2717_v21 }
 0x125   : > { %v749_v28 = vadd.f32 %v748_v24, %v747_v26  ;;  %v1223_v29 = vadd.f32 %v4340_v25, %v1220_v27  ;;  %v2790_v24 = vand.u32 4294901760, %v2789_v20 }
 0x126   : > { %v2799_v25 = vsub.f32 %v2717_v21, %v2798_v23 }
 0x127   : > { %v2182_v30 = vand.u32 4294901760, %v749_v28  ;;  %v2185_v31 = vand.u32 4294901760, %v1223_v29  ;;  %v2791_v26 = vsub.f32 %v2789_v20, %v2790_v24 }
 0x128   : > { %v2800_v27 = vand.u32 4294901760, %v2799_v25 }
 0x129   : > { %v2272_v32 = vsub.f32 %v749_v28, %v2182_v30  ;;  %v5567_v33 = vpack.c.bf16 %v2185_v31, %v2182_v30  ;;  %v2279_v34 = vsub.f32 %v1223_v29, %v2185_v31  ;;  %v2792_v28 = vand.u32 4294901760, %v2791_v26 }
 0x12a   : > { %v2801_v29 = vsub.f32 %v2799_v25, %v2800_v27 }
 0x12b   : > { %v2273_v35 = vand.u32 4294901760, %v2272_v32  ;;  %v2280_v36 = vand.u32 4294901760, %v2279_v34  ;;  %4974 = vmatprep.subr.bf16.mxu1 %v5567_v33  ;;  %4998 = vmatprep.subr.bf16.mxu0 %v5567_v33  ;;  %v5571_v37 = vpack.c.bf16 %v2279_v34, %v2272_v32 }
 0x12c   : > { %4976 = vmatpush3.bf16.msra.mxu1 %v5567_v33  ;;  %5000 = vmatpush3.bf16.msra.mxu0 %v5567_v33 }
 0x12d   : > { %v2274_v38 = vsub.f32 %v2272_v32, %v2273_v35  ;;  %v2281_v39 = vsub.f32 %v2279_v34, %v2280_v36  ;;  %v5575_v40 = vpack.c.bf16 %v2280_v36, %v2273_v35 }
 0x12f   : > { %v2275_v41 = vand.u32 4294901760, %v2274_v38  ;;  %v2282_v42 = vand.u32 4294901760, %v2281_v39 }
 0x131   : > { %v5577_v43 = vpack.c.bf16 %v2282_v42, %v2275_v41 }
 0x14c   : > { %v1690_v50 = vpop.f32.mrb[2].mxu0  ;;  %v2164_v51 = vpop.f32.mrb[2].mxu1 }
 0x14d   : > { %v5071_v52 = vadd.f32 %v4344_v47, %v1690_v50  ;;  %v5072_v53 = vadd.f32 %v4349_v48, %v2164_v51  ;;  %v4666_v54 = vpop.f32.mrb[3].mxu0  ;;  %v4708_v55 = vpop.f32.mrb[3].mxu1 }
 0x14e   : > { %v2709_v55 = vld [vmem:[%s5734_s5] sm:$0xff] }
 0x14f   : > { %v1694_v58 = vmax.f32 %v5071_v52, 0.0  ;;  %v2168_v59 = vmax.f32 %v5072_v53, 0.0 }
 0x151   : > { %v1697_v61 = vadd.f32 %v4345_v56, %v1694_v58  ;;  %v2171_v62 = vadd.f32 %v4350_v57, %v2168_v59  ;;  %v3752_v57 = vand.u32 4294901760, %v2709_v55 }
 0x153   : > { %v2188_v0 = vand.u32 4294901760, %v1697_v61  ;;  %v2191_v1 = vand.u32 4294901760, %v2171_v62  ;;  %v3839_v59 = vsub.f32 %v2709_v55, %v3752_v57 }
 0x155   : > { %v2286_v4 = vsub.f32 %v1697_v61, %v2188_v0  ;;  %v5605_v5 = vpack.c.bf16 %v2191_v1, %v2188_v0  ;;  %v2293_v6 = vsub.f32 %v2171_v62, %v2191_v1  ;;  %v3840_v63 = vand.u32 4294901760, %v3839_v59 }
 0x157   : > { %v2287_v8 = vand.u32 4294901760, %v2286_v4  ;;  %v2294_v10 = vand.u32 4294901760, %v2293_v6  ;;  %4978 = vmatprep.subr.bf16.mxu1 %v5605_v5  ;;  %5002 = vmatprep.subr.bf16.mxu0 %v5605_v5  ;;  %v4993_v11 = vpack.c.bf16 %v2293_v6, %v2286_v4  ;;  %v3841_v2 = vsub.f32 %v3839_v59, %v3840_v63 }
 0x158   : > { %4980 = vmatpush3.bf16.msra.mxu1 %v5605_v5  ;;  %5004 = vmatpush3.bf16.msra.mxu0 %v5605_v5 }
 0x159   : > { %v2288_v9 = vsub.f32 %v2286_v4, %v2287_v8  ;;  %v2295_v15 = vsub.f32 %v2293_v6, %v2294_v10  ;;  %4982 = vmatprep.subr.bf16.mxu1 %v5577_v43  ;;  %5006 = vmatprep.subr.bf16.mxu0 %v5575_v40  ;;  %v5616_v16 = vpack.c.bf16 %v2294_v10, %v2287_v8  ;;  %v3842_v6 = vand.u32 4294901760, %v3841_v2 }
 0x15b   : > { %4718 = vmatmul.mubr.f32.vlgmr.msra.gmra.mrb[4].mxu1 %v2264_v3  ;;  %4751 = vmatmul.mubr.f32.vlgmr.msra.gmra.mrb[4].mxu0 %v2262_v60  ;;  %v2289_v18 = vand.u32 4294901760, %v2288_v9  ;;  %v2296_v19 = vand.u32 4294901760, %v2295_v15  ;;  %v4354_v3 = vld [vmem:[%s5735_s6] ss:$0 sm:$0xff] }
 0x15c   : > { %4984 = vmatpush3.bf16.msra.mxu1 %v5577_v43  ;;  %5008 = vmatpush3.bf16.msra.mxu0 %v5575_v40 }
 0x15d   : > { %5010 = vmatprep.subr.bf16.mxu0 %v5616_v16  ;;  %v4985_v22 = vpack.c.bf16 %v2296_v19, %v2289_v18  ;;  %4728 = vmatprep.mubr.f32.mxu1 %v5548_v12 }
 0x15e   : > { %4761 = vmatprep.mubr.f32.mxu0 %v5548_v12 }
 0x15f   : > { %4986 = vmatprep.subr.bf16.mxu1 %v4985_v22 }
 0x160   : > { %4988 = vmatpush3.bf16.msra.mxu1 %v4985_v22  ;;  %5012 = vmatpush3.bf16.msra.mxu0 %v5616_v16 }
 0x161   : > { %4990 = vmatprep.subr.bf16.mxu1 %v5571_v37  ;;  %5014 = vmatprep.subr.bf16.mxu0 %v5567_v33 }
 0x163   : > { %4729 = vmatmul.mubr.f32.vlgmr.msra.gmra.mrb[4].mxu1 %v5583_v46  ;;  %4762 = vmatmul.mubr.f32.vlgmr.msra.gmra.mrb[4].mxu0 %v5583_v46 }
 0x164   : > { %4992 = vmatpush3.bf16.msra.mxu1 %v5571_v37  ;;  %5016 = vmatpush3.bf16.msra.mxu0 %v5567_v33 }
 0x165   : > { %4994 = vmatprep.subr.bf16.mxu1 %v4993_v11  ;;  %5018 = vmatprep.subr.bf16.mxu0 %v5605_v5 }
 0x166   : > { %4739 = vmatprep.mubr.f32.mxu1 %v5551_v13  ;;  %4772 = vmatprep.mubr.f32.mxu0 %v5548_v12  ;;  %v2802_v13 = vand.u32 4294901760, %v2801_v29  ;;  %v4353_v12 = vld [vmem:[%s5734_s5 + $0x8] sm:$0xff] }
 0x167   : > { %v3257_v30 = vand.u32 4294901760, %v4353_v12 }
 0x168   : > { %4996 = vmatpush3.bf16.msra.mxu1 %v4993_v11  ;;  %5020 = vmatpush3.bf16.msra.mxu0 %v5605_v5 }
 0x169   : > { %5022 = vmatprep.subr.bf16.mxu1 %v5567_v33  ;;  %4841 = vmatprep.subr.mxu0 %v3257_v30  ;;  %v3344_v31 = vsub.f32 %v4353_v12, %v3257_v30 }
 0x16b   : > { %4740 = vmatmul.mubr.f32.vlgmr.msra.gmra.mrb[4].mxu1 %v5592_v49  ;;  %4773 = vmatmul.mubr.f32.vlgmr.msra.gmra.mrb[4].mxu0 %v5583_v46  ;;  %v3345_v32 = vand.u32 4294901760, %v3344_v31 }
 0x16c   : > { %5024 = vmatpush3.bf16.msra.mxu1 %v5567_v33  ;;  %4783 = vmatprep.mubr.f32.mxu1 %v2792_v28 }
 0x16d   : > { %5026 = vmatprep.subr.bf16.mxu1 %v5605_v5  ;;  %4842 = vmatpush3.msra.mxu0 %v3257_v30  ;;  %v3346_v34 = vsub.f32 %v3344_v31, %v3345_v32 }
 0x16f   : > { %v3347_v35 = vand.u32 4294901760, %v3346_v34 }
 0x170   : > { %5028 = vmatpush3.bf16.msra.mxu1 %v5605_v5 }
 0x171   : > { %5030 = vmatprep.subr.bf16.mxu1 %v5577_v43  ;;  %4846 = vmatprep.subr.mxu0 %v3347_v35 }
 0x173   : > { %4784 = vmatmul.mubr.f32.vlgmr.msra.gmra.mrb[6].mxu1 %v2802_v13 }
 0x174   : > { %5032 = vmatpush3.bf16.msra.mxu1 %v5577_v43  ;;  %4794 = vmatprep.mubr.f32.mxu1 %v5612_v14 }
 0x175   : > { %5034 = vmatprep.subr.bf16.mxu1 %v4985_v22 }
 0x178   : > { %5036 = vmatpush3.bf16.msra.mxu1 %v4985_v22 }
 0x179   : > { %5038 = vmatprep.subr.bf16.mxu1 %v5571_v37 }
 0x17b   : > { %4795 = vmatmul.mubr.f32.vlgmr.msra.gmra.mrb[6].mxu1 %v2798_v23 }
 0x17c   : > { %5040 = vmatpush3.bf16.msra.mxu1 %v5571_v37  ;;  %4805 = vmatprep.mubr.f32.mxu1 %v2789_v20 }
 0x17d   : > { %5042 = vmatprep.subr.bf16.mxu1 %v4993_v11 }
 0x180   : > { %5044 = vmatpush3.bf16.msra.mxu1 %v4993_v11 }
 0x181   : > { %5046 = vmatprep.subr.bf16.mxu1 %v5567_v33 }
 0x183   : > { %4806 = vmatmul.mubr.f32.vlgmr.msra.gmra.mrb[6].mxu1 %v2799_v25 }
 0x184   : > { %5048 = vmatpush3.bf16.msra.mxu1 %v5567_v33  ;;  %4816 = vmatprep.mubr.f32.mxu1 %v2790_v24 }
 0x185   : > { %5050 = vmatprep.subr.bf16.mxu1 %v5605_v5 }
 0x188   : > { %5052 = vmatpush3.bf16.msra.mxu1 %v5605_v5 }
 0x189   : > { %5054 = vmatprep.subr.bf16.mxu1 %v5575_v40 }
 0x18b   : > { %4817 = vmatmul.mubr.f32.vlgmr.msra.gmra.mrb[6].mxu1 %v2800_v27 }
 0x18c   : > { %5056 = vmatpush3.bf16.msra.mxu1 %v5575_v40  ;;  %4827 = vmatprep.mubr.f32.mxu1 %v5612_v14 }
 0x18d   : > { %5058 = vmatprep.subr.bf16.mxu1 %v5616_v16 }
 0x190   : > { %5060 = vmatpush3.bf16.msra.mxu1 %v5616_v16 }
 0x191   : > { %5062 = vmatprep.subr.bf16.mxu1 %v5567_v33 }
 0x193   : > { %4828 = vmatmul.mubr.f32.vlgmr.msra.gmra.mrb[6].mxu1 %v2798_v23 }
 0x194   : > { %5064 = vmatpush3.bf16.msra.mxu1 %v5567_v33  ;;  %4838 = vmatprep.mubr.f32.mxu1 %v5612_v14 }
 0x195   : > { %5066 = vmatprep.subr.bf16.mxu1 %v5605_v5 }
 0x198   : > { %5068 = vmatpush3.bf16.msra.mxu1 %v5605_v5 }
 0x19b   : > { %4839 = vmatmul.mubr.f32.vlgmr.msra.gmra.mrb[6].mxu1 %v2798_v23 }
 0x23e   : > { %v4741_v33 = vpop.f32.mrb[4].mxu1  ;;  %v4774_v36 = vpop.f32.mrb[4].mxu0 }
 0x23f   : > { %v5073_v37 = vadd.f32 %v4774_v36, %v4741_v33  ;;  %v2443_v38 = vpop.f32.mrb[5].mxu1  ;;  %v2699_v39 = vpop.f32.mrb[5].mxu0 }
 0x240   : > { %v5074_v40 = vadd.f32 %v2699_v39, %v2443_v38 }
 0x241   : > { %v3749_v60 = vsel %vm3249_vm3, %v5073_v37, 0 }
 0x242   : > { %v3746_v56 = vsel %vm3249_vm3, %v5074_v40, 0  ;;  %v3827_v62 = vand.u32 4294901760, %v3749_v60 }
 0x243   : > { %v3817_v58 = vand.u32 4294901760, %v3746_v56 }
 0x244   : > { %v3828_v1 = vsub.f32 %v3749_v60, %v3827_v62 }
 0x245   : > { %v3818_v61 = vsub.f32 %v3746_v56, %v3817_v58 }
 0x246   : > { %v3829_v5 = vand.u32 4294901760, %v3828_v1 }
 0x247   : > { %v3819_v0 = vand.u32 4294901760, %v3818_v61 }
 0x248   : > { %v3830_v8 = vsub.f32 %v3828_v1, %v3829_v5 }
 0x249   : > { %v3820_v4 = vsub.f32 %v3818_v61, %v3819_v0 }
 0x24a   : > { %v3831_v10 = vand.u32 4294901760, %v3830_v8 }
 0x24b   : > { %v3821_v7 = vand.u32 4294901760, %v3820_v4 }
 0x26e   : > { %v4840_v41 = vpop.f32.mrb[6].mxu1 }
 0x26f   : > { %v3254_v42 = vsel %vm3249_vm3, %v4840_v41, 0  ;;  %v3237_v43 = vpop.f32.mrb[7].mxu1 }
 0x270   : > { %v3332_v44 = vand.u32 4294901760, %v3254_v42  ;;  %v3251_v45 = vsel %vm3249_vm3, %v3237_v43, 0 }
 0x271   : > { %v3322_v46 = vand.u32 4294901760, %v3251_v45 }
 0x272   : > { %v3333_v47 = vsub.f32 %v3254_v42, %v3332_v44 }
 0x273   : > { %v3323_v48 = vsub.f32 %v3251_v45, %v3322_v46 }
 0x274   : > { %v3334_v49 = vand.u32 4294901760, %v3333_v47 }
 0x275   : > { %v3324_v50 = vand.u32 4294901760, %v3323_v48 }
 0x276   : > { %v3335_v51 = vsub.f32 %v3333_v47, %v3334_v49 }
 0x277   : > { %v3325_v52 = vsub.f32 %v3323_v48, %v3324_v50 }
 0x278   : > { %v3336_v54 = vand.u32 4294901760, %v3335_v51 }
 0x279   : > { %v3326_v53 = vand.u32 4294901760, %v3325_v52 }
 0x27b   : > { %4843 = vmatprep.mubr.f32.mxu0 %v3326_v53 }
 0x27c   : > { %4844 = vmatmul.mubr.f32.vlgmr.msra.gmra.mrb[6].mxu0 %v3336_v54 }
 0x27d   : > { %4847 = vmatpush3.msra.mxu0 %v3347_v35  ;;  %4848 = vmatprep.mubr.f32.mxu0 %v3322_v46 }
 0x27e   : > { %4851 = vmatprep.subr.mxu0 %v3344_v31 }
 0x284   : > { %4849 = vmatmul.mubr.f32.vlgmr.msra.gmra.mrb[6].mxu0 %v3332_v44 }
 0x285   : > { %4852 = vmatpush3.msra.mxu0 %v3344_v31  ;;  %4853 = vmatprep.mubr.f32.mxu0 %v3323_v48 }
 0x286   : > { %4856 = vmatprep.subr.mxu0 %v3257_v30 }
 0x28c   : > { %4854 = vmatmul.mubr.f32.vlgmr.msra.gmra.mrb[6].mxu0 %v3333_v47 }
 0x28d   : > { %4857 = vmatpush3.msra.mxu0 %v3257_v30  ;;  %4858 = vmatprep.mubr.f32.mxu0 %v3324_v50 }
 0x28e   : > { %4861 = vmatprep.subr.mxu0 %v3345_v32 }
 0x294   : > { %4859 = vmatmul.mubr.f32.vlgmr.msra.gmra.mrb[6].mxu0 %v3334_v49 }
 0x295   : > { %4862 = vmatpush3.msra.mxu0 %v3345_v32  ;;  %4863 = vmatprep.mubr.f32.mxu0 %v3322_v46 }
 0x296   : > { %4866 = vmatprep.subr.mxu0 %v3257_v30 }
 0x29c   : > { %4864 = vmatmul.mubr.f32.vlgmr.msra.gmra.mrb[6].mxu0 %v3332_v44 }
 0x29d   : > { %4867 = vmatpush3.msra.mxu0 %v3257_v30  ;;  %4868 = vmatprep.mubr.f32.mxu0 %v3322_v46 }
 0x29e   : > { %4871 = vmatprep.subr.mxu0 %v3752_v57 }
 0x2a4   : > { %4869 = vmatmul.mubr.f32.vlgmr.msra.gmra.mrb[6].mxu0 %v3332_v44 }
 0x2a5   : > { %4872 = vmatpush3.msra.mxu0 %v3752_v57  ;;  %4873 = vmatprep.mubr.f32.mxu0 %v3821_v7 }
 0x2a6   : > { %4876 = vmatprep.subr.mxu0 %v3842_v6 }
 0x2ac   : > { %4874 = vmatmul.mubr.f32.vlgmr.msra.gmra.mrb[6].mxu0 %v3831_v10 }
 0x2ad   : > { %4877 = vmatpush3.msra.mxu0 %v3842_v6  ;;  %4878 = vmatprep.mubr.f32.mxu0 %v3817_v58 }
 0x2ae   : > { %4881 = vmatprep.subr.mxu0 %v3839_v59 }
 0x2b4   : > { %4879 = vmatmul.mubr.f32.vlgmr.msra.gmra.mrb[6].mxu0 %v3827_v62 }
 0x2b5   : > { %4882 = vmatpush3.msra.mxu0 %v3839_v59  ;;  %4883 = vmatprep.mubr.f32.mxu0 %v3818_v61 }
 0x2b6   : > { %4886 = vmatprep.subr.mxu0 %v3752_v57 }
 0x2bc   : > { %4884 = vmatmul.mubr.f32.vlgmr.msra.gmra.mrb[6].mxu0 %v3828_v1 }
 0x2bd   : > { %4887 = vmatpush3.msra.mxu0 %v3752_v57  ;;  %4888 = vmatprep.mubr.f32.mxu0 %v3819_v0 }
 0x2be   : > { %4891 = vmatprep.subr.mxu0 %v3840_v63 }
 0x2c4   : > { %4889 = vmatmul.mubr.f32.vlgmr.msra.gmra.mrb[6].mxu0 %v3829_v5 }
 0x2c5   : > { %4892 = vmatpush3.msra.mxu0 %v3840_v63  ;;  %4893 = vmatprep.mubr.f32.mxu0 %v3817_v58 }
 0x2c6   : > { %4896 = vmatprep.subr.mxu0 %v3752_v57 }
 0x2cc   : > { %4894 = vmatmul.mubr.f32.vlgmr.msra.gmra.mrb[6].mxu0 %v3827_v62 }
 0x2cd   : > { %4897 = vmatpush3.msra.mxu0 %v3752_v57  ;;  %4898 = vmatprep.mubr.f32.mxu0 %v3817_v58 }
 0x2d4   : > { %4899 = vmatmul.mubr.f32.vlgmr.msra.gmra.mrb[6].mxu0 %v3827_v62 }
 0x3a7   : > { %v4900_v11 = vpop.f32.mrb[6].mxu0 }
 0x3a8   : > { %v4248_v14 = vadd.f32 %v4900_v11, %v4354_v3  ;;  %v4230_v9 = vpop.f32.mrb[7].mxu0 }
 0x3a9   : > { %v4247_v15 = vadd.f32 %v4354_v3, %v4230_v9 }
 0x3aa   : > { %v4250_v16 = vmax.f32 %v4248_v14, 0.0 }
 0x3ab   : > { %v4249_v17 = vmax.f32 %v4247_v15, 0.0 }
 0x3ac   : > { %4252 = vst.msk [vmem:[%s269_s29 + $0x8] sm:$0xff] %vm2174_vm2, %v4250_v16 }
 0x3ad   : > { %4251 = vst.msk [vmem:[%s269_s29] sm:$0xff] %vm2174_vm2, %v4249_v17 }
 0x3ae   : > { %5212 = shalt.err (!%p5209_p3)
}
 0x3af   : > { %s5213_s20 = scalar_lea.hbm %s5684_s15, 256  ;;  %s5217_s23 = scalar_lea.hbm %s5736_s7, 512 }
 0x3b0   : > { %p5214_p4 = scmp.ne.s32.totalorder %s5684_s15, %s5213_s20  ;;  %p5218_p9 = scmp.lt.u32.totalorder %s5684_s15, %s5736_s7 }
 0x3b1   : > { %p5219_p10 = scmp.lt.u32.totalorder %s5217_s23, %s5213_s20  ;;  %p5221_p12 = scmp.lt.u32.totalorder %s5213_s20, %s5684_s15 }
 0x3b2   : > { %p5215_p7 = pnand %p5214_p4, %p5347_p5 }
 0x3b3   : > { %p5220_p11 = por %p5219_p10, %p5218_p9 }
 0x3b4   : > { %p5216_p8 = pneg %p5215_p7 }
 0x3b5   : > { %p5222_p13 = por %p5221_p12, %p5220_p11 }
 0x3b7   : > { %p5223_p0 = pnand %p5222_p13, %p5216_p8 }
 0x3b9   : > { %5226 = shalt.err (!%p5223_p0)
}
 0x3ba   : > { %s5267_s13 = smov 128   ;;  %s5268_s14 = smov 8  }
 0x3bb   : > { %5155 = dma.vmem_to_hbm [thread:$0]  (%p5347_p5), %s5679_s8, 256, %s5684_s15, %s5688_s28, %s5267_s13, %s5267_s13, %s5268_s14  }
 0x3bc PF: > { %p5161_p1 = scmp.ge.s32.totalorder %s5261_s27, 2  ;;  %s4282_s16 = sand.u32 1, %s5249_s24  }
 0x3bd   : > { %s4283_s17 = scalar_lea.sflag [#allocation3], %s4282_s16 }
 0x3be   : > { %p5158_p2 = pnand %p5161_p1, %p5351_p6 }
 0x3c0   : > { %5244 = dma.done.wait (!%p5158_p2), %s4283_s17, 256  }
 0x3c1   : > { %5246 = vsyncadd (!%p5158_p2), %s4283_s17, 4294967040  ;;  %p17_p3 = scmp.ge.s32.totalorder %s5334_s30, 4   ;;  %s5739_s24 = smov %s5253_s25 }
 0x3c2   : > { %s5740_s25 = smov %s5257_s26  ;;  %s5741_s26 = smov %s5345_s10 }
 0x3c3   : > { %s5742_s27 = smov %s5334_s30  ;;  %19 = sbr.rel (!%p17_p3) target bundleno = 3 (0x3), region = 94 }
 0x3ca   :  { %4288 = vsyncpa [#allocation3], 1 }
 0x3cb   :  { %4290 = vsyncpa [#allocation3 + $0x1], 1 }

</bundles_post_ra>
